<compile_context>
chip_gen: v5e
topology: v5e:2x2
jax: 0.10.0
libtpu: 0.0.40
codegen_flags: <defaults>
</compile_context>

<pallas_src>
import functools

import jax
import jax.numpy as jnp
from jax.experimental import pallas as pl
from jax.experimental.pallas import tpu as pltpu


def _round_up(x, m):
    return (x + m - 1) // m * m


def _gcd(a, b):
    while b:
        a, b = b, a % b
    return a


def _int_pow(x, n):
    """x**n for static int n >= 1 via square-and-multiply (VPU only)."""
    acc = None
    base = x
    while n > 0:
        if n & 1:
            acc = base if acc is None else acc * base
        n >>= 1
        if n:
            base = base * base
    return acc


def _gem_kernel(x_ref, w_ref, o_ref, *, p, eps, int_p, inv_l, compute_dtype):
    # x_ref: (TRS, LS) tile of super-rows; each super-row packs G logical
    #        (N*C) rows of L = H*W spatial elements along the lane axis.
    # w_ref: (LS, G) block-diagonal ones matrix (constant block index -> DMA'd
    #        once and kept resident).
    # o_ref: (TRS, G) pooled outputs.
    x = x_ref[...].astype(compute_dtype)                # no-op on the native path
    x = jnp.maximum(x, jnp.asarray(eps, compute_dtype))  # clamp(min=eps)
    if int_p is not None:
        xp = _int_pow(x, int_p)                          # VPU multiplies, EUP free
    else:
        # TODO(synk): float p issues 2 transcendentals/elem into the single EUP
        # slot and can cap throughput below the HBM roofline on v7x.
        xp = jnp.power(x, p)
    # Per-row mean on the otherwise-idle MXU: the block-diagonal ones matrix
    # contracts each group of L lanes into its own output column, accumulating
    # in f32.  Garbage / zero-padded rows only affect their own (discarded)
    # output rows, never real ones.
    s = jnp.dot(xp, w_ref[...], preferred_element_type=jnp.float32)
    m = s * inv_l                                        # exact f32 scale by 1/(H*W)
    # Final (1/p)-root is per-row only -> negligible transcendental cost.
    o_ref[...] = jnp.power(m, 1.0 / p).astype(o_ref.dtype)


def gem(x, p=3.0, eps=1e-6):
    """GeM pooling.  x: (N, C, H, W) -> (N, C, 1, 1)."""
    N, C, H, W = x.shape
    R, L = N * C, H * W
    itemsize = x.dtype.itemsize

    p = float(p)
    int_p = int(round(p)) if (p.is_integer() and 1.0 <= p <= 16.0) else None

    # Elementwise math stays in the native dtype for bf16/f32 integer-p (bf16
    # packs 2 elems/lane on the v6e/v7x VPU; the MXU still accumulates in f32).
    # General float-p and exotic dtypes upcast to f32.
    if int_p is not None and x.dtype.name in ("bfloat16", "float32"):
        compute_dtype = x.dtype
        compute_itemsize = itemsize
    else:
        compute_dtype = jnp.float32
        compute_itemsize = 4

    # Lane-dense packing: G rows per super-row so G*L is a multiple of 128;
    # G >= 8 keeps the MXU reduce and output block reasonably wide.
    G = max(128 // _gcd(L, 128), 8)
    sub = 8 if itemsize >= 4 else (16 if itemsize == 2 else 32)

    x2d = x.reshape(R, L)
    Rp = _round_up(R, G * sub)
    if Rp != R:
        # Zero rows clamp to eps and end up in discarded output slots.
        x2d = jnp.pad(x2d, ((0, Rp - R), (0, 0)))
    RS, LS = Rp // G, G * L
    xs = x2d.reshape(RS, LS)          # pure view: row-major layout is unchanged

    # Block-diagonal ones: column g sums lanes [g*L, (g+1)*L).
    w = (jnp.arange(LS)[:, None] // L == jnp.arange(G)[None, :]).astype(compute_dtype)

    # Row-tile sizing: ~8 MiB of compute-dtype data per block, clamped so the
    # parallel grid keeps >= 8 steps (v7x: 2 TensorCores) when blocks >= 1 MiB.
    target_elems = (8 << 20) // compute_itemsize
    tr = max(sub, (target_elems // max(1, LS)) // sub * sub)
    per8 = _round_up(pl.cdiv(RS, 8), sub)
    if per8 * LS * itemsize >= (1 << 20):
        tr = min(tr, per8)
    TRS = min(tr, _round_up(RS, sub))
    grid = (pl.cdiv(RS, TRS),)

    # Explicit VMEM budget: 2x double-buffered input blocks + ~2 fused
    # compute-dtype intermediates (the MXU operand is materialized) + the
    # resident reduce matrix (+its second buffer) + outputs + margin.
    # Fits comfortably inside v7x's 64 MiB physical VMEM for normal GeM shapes.
    # TODO(synk): multi-MiB single rows (huge H*W) would need in-kernel
    # L-chunking with an accumulator to bound this further.
    blk_in = TRS * LS * itemsize
    blk_comp = TRS * LS * compute_itemsize
    w_bytes = LS * G * compute_itemsize
    out_blk = TRS * G * 4
    vmem_budget = 2 * blk_in + 2 * blk_comp + 2 * w_bytes + 2 * out_blk + (8 << 20)
    vmem_limit = int(max(32 << 20, vmem_budget))

    kernel = functools.partial(
        _gem_kernel, p=p, eps=float(eps), int_p=int_p,
        inv_l=float(1.0 / L), compute_dtype=compute_dtype)

    n_trans = 2 * R if int_p is not None else 2 * R * L + 2 * R
    cost = pl.CostEstimate(
        flops=6 * Rp * L,
        transcendentals=n_trans,
        bytes_accessed=Rp * L * itemsize + w_bytes + Rp * itemsize,
    )

    out2d = pl.pallas_call(
        kernel,
        out_shape=jax.ShapeDtypeStruct((RS, G), x.dtype),
        grid_spec=pltpu.PrefetchScalarGridSpec(
            num_scalar_prefetch=0,
            grid=grid,
            in_specs=[pl.BlockSpec((TRS, LS), lambda i: (i, 0)),
                      pl.BlockSpec((LS, G), lambda i: (0, 0))],
            out_specs=pl.BlockSpec((TRS, G), lambda i: (i, 0)),
        ),
        # Rows are independent -> "parallel" lets v7x shard the grid over its
        # 2 TensorCores; neutral on v5e/v6e.
        compiler_params=pltpu.CompilerParams(
            dimension_semantics=("parallel",),
            vmem_limit_bytes=vmem_limit),
        cost_estimate=cost,
    )(xs, w)

    return out2d.reshape(Rp)[:R].reshape(N, C, 1, 1)


def gem_reference(x, p=3.0, eps=1e-6):
    xc = jnp.maximum(x.astype(jnp.float32), eps) ** p
    m = jnp.mean(xc, axis=(-2, -1), keepdims=True)
    return (m ** (1.0 / p)).astype(x.dtype)


if __name__ == "__main__":
    key = jax.random.PRNGKey(0)
    # Small shapes consistent with the module's NCHW conv-feature input.
    N, C, H, W = 2, 4, 16, 16
    x = jax.random.normal(key, (N, C, H, W), dtype=jnp.float32)

    # GeM(p=3, eps=1e-6, p_trainable=False): p is a plain constant, no params.
    out = jax.block_until_ready(gem(x, p=3.0, eps=1e-6))
    ref = gem_reference(x, p=3.0, eps=1e-6)
    assert out.shape == (N, C, 1, 1), out.shape
    assert jnp.allclose(out, ref, rtol=2e-5, atol=1e-6), (
        float(jnp.max(jnp.abs(out - ref))))

    # Lane-dense grouped path: small spatial extent (7x7 -> 128 rows/super-row).
    x7 = jax.random.normal(jax.random.PRNGKey(1), (2, 4, 7, 7), dtype=jnp.float32)
    out7 = jax.block_until_ready(gem(x7, p=3.0, eps=1e-6))
    ref7 = gem_reference(x7, p=3.0, eps=1e-6)
    assert out7.shape == (2, 4, 1, 1), out7.shape
    assert jnp.allclose(out7, ref7, rtol=2e-5, atol=1e-6), (
        float(jnp.max(jnp.abs(out7 - ref7))))

    # bf16 path: clamp/cube stay bf16 on the VPU, f32 accumulation on the MXU.
    xb = x.astype(jnp.bfloat16)
    outb = jax.block_until_ready(gem(xb, p=3.0, eps=1e-6))
    refb = gem_reference(xb, p=3.0, eps=1e-6)
    assert outb.shape == (N, C, 1, 1), outb.shape
    assert jnp.allclose(outb.astype(jnp.float32), refb.astype(jnp.float32),
                        rtol=3e-2, atol=1e-3), (
        float(jnp.max(jnp.abs(outb.astype(jnp.float32) - refb.astype(jnp.float32)))))

    # General (non-integer) p exercises the EUP pow path.
    outf = jax.block_until_ready(gem(x, p=2.5, eps=1e-6))
    reff = gem_reference(x, p=2.5, eps=1e-6)
    assert jnp.allclose(outf, reff, rtol=5e-4, atol=1e-6), (
        float(jnp.max(jnp.abs(outf - reff))))

    print("KERNEL_OK")
</pallas_src>

<mosaic_0001>
module attributes {stable_mosaic.version = 11 : i64} {
  func.func @_gem_kernel(%arg0: i32, %arg1: memref<8x2048xf32, #tpu.memory_space<vmem>>, %arg2: memref<2048x8xf32, #tpu.memory_space<vmem>>, %arg3: memref<8x8xf32, #tpu.memory_space<vmem>>) attributes {dimension_semantics = [#tpu.dimension_semantics<parallel>], iteration_bounds = array<i64: 1>, scalar_prefetch = 0 : i64, scratch_operands = 0 : i64, tpu.core_type = #tpu.core_type<tc>, window_params = [{transform_indices = @transform_0, window_bounds = array<i64: 8, 2048>}, {pipeline_mode = #tpu.pipeline_mode<synchronous>, transform_indices = @transform_1, window_bounds = array<i64: 2048, 8>}, {transform_indices = @transform_2, window_bounds = array<i64: 8, 8>}]} {
    %c0 = arith.constant 0 : index
    %c0_0 = arith.constant 0 : index
    %0 = vector.load %arg1[%c0, %c0_0] : memref<8x2048xf32, #tpu.memory_space<vmem>>, vector<8x2048xf32>
    %cst = arith.constant 9.99999997E-7 : f32
    %1 = vector.broadcast %cst : f32 to vector<8x2048xf32>
    %2 = arith.maximumf %0, %1 : vector<8x2048xf32>
    %3 = arith.mulf %2, %2 : vector<8x2048xf32>
    %4 = arith.mulf %2, %3 : vector<8x2048xf32>
    %c0_1 = arith.constant 0 : index
    %c0_2 = arith.constant 0 : index
    %5 = vector.load %arg2[%c0_1, %c0_2] : memref<2048x8xf32, #tpu.memory_space<vmem>>, vector<2048x8xf32>
    %cst_3 = arith.constant dense<0.000000e+00> : vector<8x8xf32>
    %6 = tpu.matmul %4, %5, %cst_3 {dimension_numbers = #tpu.dot_dimension_numbers<[1], [0], [0], [1], [0, 0, 1, 1], [], []>} : vector<8x2048xf32>, vector<2048x8xf32>, vector<8x8xf32> -> vector<8x8xf32>
    %cst_4 = arith.constant 3.906250e-03 : f32
    %7 = vector.broadcast %cst_4 : f32 to vector<8x8xf32>
    %8 = arith.mulf %6, %7 : vector<8x8xf32>
    %cst_5 = arith.constant 0.333333343 : f32
    %9 = vector.broadcast %cst_5 : f32 to vector<8x8xf32>
    %10 = math.powf %8, %9 : vector<8x8xf32>
    %c0_6 = arith.constant 0 : index
    %c0_7 = arith.constant 0 : index
    %11 = vector.load %arg3[%c0_6, %c0_7] : memref<8x8xf32, #tpu.memory_space<vmem>>, vector<8x8xf32>
    tpu.vector_store %arg3[%c0_6, %c0_7], %10 {strides = array<i32>} : memref<8x8xf32, #tpu.memory_space<vmem>>, vector<8x8xf32>,
    return
  }
  func.func @transform_0(%arg0: i32) -> (i32, i32) {
    %c0_i32 = arith.constant 0 : i32
    %c0_i32_0 = arith.constant 0 : i32
    return %arg0, %c0_i32 : i32, i32
  }
  func.func @transform_1(%arg0: i32) -> (i32, i32) {
    %c0_i32 = arith.constant 0 : i32
    %c0_i32_0 = arith.constant 0 : i32
    %c0_i32_1 = arith.constant 0 : i32
    return %c0_i32, %c0_i32_0 : i32, i32
  }
  func.func @transform_2(%arg0: i32) -> (i32, i32) {
    %c0_i32 = arith.constant 0 : i32
    %c0_i32_0 = arith.constant 0 : i32
    return %arg0, %c0_i32 : i32, i32
  }
}

</mosaic_0001>

<bundles_post_ra>
// kernel: tpu_custom_call.1
= control target key start
LH: loop header
LB: loop body
LE: loop exit
PB: predicated region body
PF: predicated region fallthrough
CT: control target
= control target key end

     0   :  { %s1562_s0 = inlined_call_operand.vmem [shape: f32[8,2048], index: 0, kind: input, shape index: {}]   ;;  %s1563_s1 = inlined_call_operand.vmem [shape: f32[2048,8], index: 1, kind: input, shape index: {}]   ;;  %s1564_s2 = inlined_call_operand.hbm [shape: f32[8,8], index: 2, kind: output, shape index: {}]  }
   0x1   :  { %v91_v0 = vld [vmem:[%s1563_s1 + $0x78] sm:$0xff]  ;;  %v90_v2 = vld [vmem:[%s1563_s1 + $0x70] sm:$0xff]  ;;  %v89_v6 = vld [vmem:[%s1563_s1 + $0x68] sm:$0xff] }
   0x2   :  { %v123_v1 = vld [vmem:[%s1563_s1 + $0x178] sm:$0xff]  ;;  %332 = vmatpush.msra.mxu0 %v91_v0  ;;  %v122_v4 = vld [vmem:[%s1563_s1 + $0x170] sm:$0xff]  ;;  %v121_v8 = vld [vmem:[%s1563_s1 + $0x168] sm:$0xff] }
   0x3   :  { %372 = vmatpush.msra.mxu2 %v123_v1  ;;  %v107_v3 = vld [vmem:[%s1563_s1 + $0xf8] sm:$0xff]  ;;  %v106_v7 = vld [vmem:[%s1563_s1 + $0xf0] sm:$0xff]  ;;  %v105_v10 = vld [vmem:[%s1563_s1 + $0xe8] sm:$0xff] }
   0x4   :  { %v139_v5 = vld [vmem:[%s1563_s1 + $0x1f8] sm:$0xff]  ;;  %352 = vmatpush.msra.mxu1 %v107_v3  ;;  %333 = vmatpush.msra.mxu0 %v90_v2  ;;  %v138_v9 = vld [vmem:[%s1563_s1 + $0x1f0] sm:$0xff]  ;;  %v88_v11 = vld [vmem:[%s1563_s1 + $0x60] sm:$0xff] }
   0x5   :  { %392 = vmatpush.msra.mxu3 %v139_v5  ;;  %373 = vmatpush.msra.mxu2 %v122_v4  ;;  %v120_v12 = vld [vmem:[%s1563_s1 + $0x160] sm:$0xff]  ;;  %v137_v13 = vld [vmem:[%s1563_s1 + $0x1e8] sm:$0xff]  ;;  %v87_v16 = vld [vmem:[%s1563_s1 + $0x58] sm:$0xff] }
   0x6   :  { %353 = vmatpush.msra.mxu1 %v106_v7  ;;  %334 = vmatpush.msra.mxu0 %v89_v6  ;;  %v104_v14 = vld [vmem:[%s1563_s1 + $0xe0] sm:$0xff]  ;;  %v119_v17 = vld [vmem:[%s1563_s1 + $0x158] sm:$0xff]  ;;  %v86_v20 = vld [vmem:[%s1563_s1 + $0x50] sm:$0xff] }
   0x7   :  { %393 = vmatpush.msra.mxu3 %v138_v9  ;;  %374 = vmatpush.msra.mxu2 %v121_v8  ;;  %v136_v15 = vld [vmem:[%s1563_s1 + $0x1e0] sm:$0xff]  ;;  %v103_v18 = vld [vmem:[%s1563_s1 + $0xd8] sm:$0xff]  ;;  %v118_v21 = vld [vmem:[%s1563_s1 + $0x150] sm:$0xff] }
   0x8   :  { %354 = vmatpush.msra.mxu1 %v105_v10  ;;  %335 = vmatpush.msra.mxu0 %v88_v11  ;;  %v135_v19 = vld [vmem:[%s1563_s1 + $0x1d8] sm:$0xff]  ;;  %v102_v22 = vld [vmem:[%s1563_s1 + $0xd0] sm:$0xff]  ;;  %v85_v24 = vld [vmem:[%s1563_s1 + $0x48] sm:$0xff] }
   0x9   :  { %394 = vmatpush.msra.mxu3 %v137_v13  ;;  %375 = vmatpush.msra.mxu2 %v120_v12  ;;  %v134_v23 = vld [vmem:[%s1563_s1 + $0x1d0] sm:$0xff]  ;;  %v117_v25 = vld [vmem:[%s1563_s1 + $0x148] sm:$0xff]  ;;  %v84_v28 = vld [vmem:[%s1563_s1 + $0x40] sm:$0xff] }
   0xa   :  { %355 = vmatpush.msra.mxu1 %v104_v14  ;;  %336 = vmatpush.msra.mxu0 %v87_v16  ;;  %v101_v26 = vld [vmem:[%s1563_s1 + $0xc8] sm:$0xff]  ;;  %v116_v29 = vld [vmem:[%s1563_s1 + $0x140] sm:$0xff]  ;;  %v83_v32 = vld [vmem:[%s1563_s1 + $0x38] sm:$0xff] }
   0xb   :  { %395 = vmatpush.msra.mxu3 %v136_v15  ;;  %376 = vmatpush.msra.mxu2 %v119_v17  ;;  %v133_v27 = vld [vmem:[%s1563_s1 + $0x1c8] sm:$0xff]  ;;  %v100_v30 = vld [vmem:[%s1563_s1 + $0xc0] sm:$0xff]  ;;  %v115_v33 = vld [vmem:[%s1563_s1 + $0x138] sm:$0xff] }
   0xc   :  { %356 = vmatpush.msra.mxu1 %v103_v18  ;;  %337 = vmatpush.msra.mxu0 %v86_v20  ;;  %v132_v31 = vld [vmem:[%s1563_s1 + $0x1c0] sm:$0xff]  ;;  %v99_v34 = vld [vmem:[%s1563_s1 + $0xb8] sm:$0xff]  ;;  %v82_v36 = vld [vmem:[%s1563_s1 + $0x30] sm:$0xff] }
   0xd   :  { %396 = vmatpush.msra.mxu3 %v135_v19  ;;  %377 = vmatpush.msra.mxu2 %v118_v21  ;;  %v131_v35 = vld [vmem:[%s1563_s1 + $0x1b8] sm:$0xff]  ;;  %v114_v37 = vld [vmem:[%s1563_s1 + $0x130] sm:$0xff]  ;;  %v81_v40 = vld [vmem:[%s1563_s1 + $0x28] sm:$0xff] }
   0xe   :  { %357 = vmatpush.msra.mxu1 %v102_v22  ;;  %338 = vmatpush.msra.mxu0 %v85_v24  ;;  %v98_v38 = vld [vmem:[%s1563_s1 + $0xb0] sm:$0xff]  ;;  %v113_v41 = vld [vmem:[%s1563_s1 + $0x128] sm:$0xff]  ;;  %v80_v44 = vld [vmem:[%s1563_s1 + $0x20] sm:$0xff] }
   0xf   :  { %397 = vmatpush.msra.mxu3 %v134_v23  ;;  %378 = vmatpush.msra.mxu2 %v117_v25  ;;  %v130_v39 = vld [vmem:[%s1563_s1 + $0x1b0] sm:$0xff]  ;;  %v97_v42 = vld [vmem:[%s1563_s1 + $0xa8] sm:$0xff]  ;;  %v112_v45 = vld [vmem:[%s1563_s1 + $0x120] sm:$0xff] }
  0x10   :  { %358 = vmatpush.msra.mxu1 %v101_v26  ;;  %339 = vmatpush.msra.mxu0 %v84_v28  ;;  %v129_v43 = vld [vmem:[%s1563_s1 + $0x1a8] sm:$0xff]  ;;  %v96_v46 = vld [vmem:[%s1563_s1 + $0xa0] sm:$0xff]  ;;  %v79_v48 = vld [vmem:[%s1563_s1 + $0x18] sm:$0xff] }
  0x11   :  { %398 = vmatpush.msra.mxu3 %v133_v27  ;;  %379 = vmatpush.msra.mxu2 %v116_v29  ;;  %v128_v47 = vld [vmem:[%s1563_s1 + $0x1a0] sm:$0xff]  ;;  %v111_v49 = vld [vmem:[%s1563_s1 + $0x118] sm:$0xff]  ;;  %v78_v52 = vld [vmem:[%s1563_s1 + $0x10] sm:$0xff] }
  0x12   :  { %359 = vmatpush.msra.mxu1 %v100_v30  ;;  %340 = vmatpush.msra.mxu0 %v83_v32  ;;  %v95_v50 = vld [vmem:[%s1563_s1 + $0x98] sm:$0xff]  ;;  %v110_v53 = vld [vmem:[%s1563_s1 + $0x110] sm:$0xff]  ;;  %v77_v56 = vld [vmem:[%s1563_s1 + $0x8] sm:$0xff] }
  0x13   :  { %399 = vmatpush.msra.mxu3 %v132_v31  ;;  %380 = vmatpush.msra.mxu2 %v115_v33  ;;  %v127_v51 = vld [vmem:[%s1563_s1 + $0x198] sm:$0xff]  ;;  %v94_v54 = vld [vmem:[%s1563_s1 + $0x90] sm:$0xff]  ;;  %v109_v57 = vld [vmem:[%s1563_s1 + $0x108] sm:$0xff] }
  0x14   :  { %360 = vmatpush.msra.mxu1 %v99_v34  ;;  %341 = vmatpush.msra.mxu0 %v82_v36  ;;  %v126_v55 = vld [vmem:[%s1563_s1 + $0x190] sm:$0xff]  ;;  %v93_v58 = vld [vmem:[%s1563_s1 + $0x88] sm:$0xff]  ;;  %v76_v60 = vld [vmem:[%s1563_s1] sm:$0xff] }
  0x15   :  { %400 = vmatpush.msra.mxu3 %v131_v35  ;;  %381 = vmatpush.msra.mxu2 %v114_v37  ;;  %v125_v59 = vld [vmem:[%s1563_s1 + $0x188] sm:$0xff]  ;;  %v108_v61 = vld [vmem:[%s1563_s1 + $0x100] sm:$0xff]  ;;  %v155_v62 = vld [vmem:[%s1563_s1 + $0x278] sm:$0xff] }
  0x16   :  { %361 = vmatpush.msra.mxu1 %v98_v38  ;;  %342 = vmatpush.msra.mxu0 %v81_v40  ;;  %v187_v63 = vld [vmem:[%s1563_s1 + $0x378] sm:$0xff]  ;;  %v92_v0 = vld [vmem:[%s1563_s1 + $0x80] sm:$0xff]  ;;  %v154_v2 = vld [vmem:[%s1563_s1 + $0x270] sm:$0xff] }
  0x17   :  { %401 = vmatpush.msra.mxu3 %v130_v39  ;;  %382 = vmatpush.msra.mxu2 %v113_v41  ;;  %v124_v1 = vld [vmem:[%s1563_s1 + $0x180] sm:$0xff]  ;;  %v171_v3 = vld [vmem:[%s1563_s1 + $0x2f8] sm:$0xff]  ;;  %v186_v4 = vld [vmem:[%s1563_s1 + $0x370] sm:$0xff] }
  0x18   :  { %362 = vmatpush.msra.mxu1 %v97_v42  ;;  %343 = vmatpush.msra.mxu0 %v80_v44  ;;  %v203_v5 = vld [vmem:[%s1563_s1 + $0x3f8] sm:$0xff]  ;;  %v153_v6 = vld [vmem:[%s1563_s1 + $0x268] sm:$0xff]  ;;  %v170_v7 = vld [vmem:[%s1563_s1 + $0x2f0] sm:$0xff] }
  0x19   :  { %402 = vmatpush.msra.mxu3 %v129_v43  ;;  %383 = vmatpush.msra.mxu2 %v112_v45  ;;  %v185_v8 = vld [vmem:[%s1563_s1 + $0x368] sm:$0xff]  ;;  %v202_v9 = vld [vmem:[%s1563_s1 + $0x3f0] sm:$0xff]  ;;  %v152_v10 = vld [vmem:[%s1563_s1 + $0x260] sm:$0xff] }
  0x1a   :  { %363 = vmatpush.msra.mxu1 %v96_v46  ;;  %344 = vmatpush.msra.mxu0 %v79_v48  ;;  %v169_v11 = vld [vmem:[%s1563_s1 + $0x2e8] sm:$0xff]  ;;  %v184_v12 = vld [vmem:[%s1563_s1 + $0x360] sm:$0xff]  ;;  %v151_v14 = vld [vmem:[%s1563_s1 + $0x258] sm:$0xff] }
  0x1b   :  { %403 = vmatpush.msra.mxu3 %v128_v47  ;;  %384 = vmatpush.msra.mxu2 %v111_v49  ;;  %v201_v13 = vld [vmem:[%s1563_s1 + $0x3e8] sm:$0xff]  ;;  %v168_v15 = vld [vmem:[%s1563_s1 + $0x2e0] sm:$0xff]  ;;  %v183_v16 = vld [vmem:[%s1563_s1 + $0x358] sm:$0xff] }
  0x1c   :  { %364 = vmatpush.msra.mxu1 %v95_v50  ;;  %345 = vmatpush.msra.mxu0 %v78_v52  ;;  %v200_v17 = vld [vmem:[%s1563_s1 + $0x3e0] sm:$0xff]  ;;  %v150_v18 = vld [vmem:[%s1563_s1 + $0x250] sm:$0xff]  ;;  %v167_v19 = vld [vmem:[%s1563_s1 + $0x2d8] sm:$0xff] }
  0x1d   :  { %404 = vmatpush.msra.mxu3 %v127_v51  ;;  %385 = vmatpush.msra.mxu2 %v110_v53  ;;  %v182_v20 = vld [vmem:[%s1563_s1 + $0x350] sm:$0xff]  ;;  %v199_v21 = vld [vmem:[%s1563_s1 + $0x3d8] sm:$0xff]  ;;  %v149_v22 = vld [vmem:[%s1563_s1 + $0x248] sm:$0xff] }
  0x1e   :  { %365 = vmatpush.msra.mxu1 %v94_v54  ;;  %346 = vmatpush.msra.mxu0 %v77_v56  ;;  %v166_v23 = vld [vmem:[%s1563_s1 + $0x2d0] sm:$0xff]  ;;  %v181_v24 = vld [vmem:[%s1563_s1 + $0x348] sm:$0xff]  ;;  %v148_v26 = vld [vmem:[%s1563_s1 + $0x240] sm:$0xff] }
  0x1f   :  { %405 = vmatpush.msra.mxu3 %v126_v55  ;;  %386 = vmatpush.msra.mxu2 %v109_v57  ;;  %v198_v25 = vld [vmem:[%s1563_s1 + $0x3d0] sm:$0xff]  ;;  %v165_v27 = vld [vmem:[%s1563_s1 + $0x2c8] sm:$0xff]  ;;  %v180_v28 = vld [vmem:[%s1563_s1 + $0x340] sm:$0xff] }
  0x20   :  { %366 = vmatpush.msra.mxu1 %v93_v58  ;;  %347 = vmatpush.msra.mxu0 %v76_v60  ;;  %v197_v29 = vld [vmem:[%s1563_s1 + $0x3c8] sm:$0xff]  ;;  %v147_v30 = vld [vmem:[%s1563_s1 + $0x238] sm:$0xff]  ;;  %v164_v31 = vld [vmem:[%s1563_s1 + $0x2c0] sm:$0xff] }
  0x21   :  { %406 = vmatpush.msra.mxu3 %v125_v59  ;;  %387 = vmatpush.msra.mxu2 %v108_v61  ;;  %v179_v32 = vld [vmem:[%s1563_s1 + $0x338] sm:$0xff]  ;;  %v196_v33 = vld [vmem:[%s1563_s1 + $0x3c0] sm:$0xff]  ;;  %v146_v34 = vld [vmem:[%s1563_s1 + $0x230] sm:$0xff] }
  0x22   :  { %412 = vmatpush.msrb.mxu0 %v155_v62  ;;  %367 = vmatpush.msra.mxu1 %v92_v0  ;;  %v163_v35 = vld [vmem:[%s1563_s1 + $0x2b8] sm:$0xff]  ;;  %v14_v36 = vld [vmem:[%s1562_s0 + $0x10] sm:$0xff]  ;;  %v145_v39 = vld [vmem:[%s1563_s1 + $0x228] sm:$0xff] }
  0x23   :  { %452 = vmatpush.msrb.mxu2 %v187_v63  ;;  %407 = vmatpush.msra.mxu3 %v124_v1  ;;  %v178_v37 = vld [vmem:[%s1563_s1 + $0x330] sm:$0xff]  ;;  %v195_v38 = vld [vmem:[%s1563_s1 + $0x3b8] sm:$0xff]  ;;  %v12_v41 = vld [vmem:[%s1562_s0] sm:$0xff]  ;;  %v30_v44 = vmax.f32 %v14_v36, 1e-06 }
  0x24   :  { %413 = vmatpush.msrb.mxu0 %v154_v2  ;;  %432 = vmatpush.msrb.mxu1 %v171_v3  ;;  %v162_v40 = vld [vmem:[%s1563_s1 + $0x2b0] sm:$0xff]  ;;  %v177_v42 = vld [vmem:[%s1563_s1 + $0x328] sm:$0xff]  ;;  %v15_v45 = vld [vmem:[%s1562_s0 + $0x18] sm:$0xff]  ;;  %v28_v50 = vmax.f32 %v12_v41, 1e-06 }
  0x25   :  { %453 = vmatpush.msrb.mxu2 %v186_v4  ;;  %472 = vmatpush.msrb.mxu3 %v203_v5  ;;  %v194_v43 = vld [vmem:[%s1563_s1 + $0x3b0] sm:$0xff]  ;;  %v144_v46 = vld [vmem:[%s1563_s1 + $0x220] sm:$0xff]  ;;  %v161_v47 = vld [vmem:[%s1563_s1 + $0x2a8] sm:$0xff]  ;;  %v31_v54 = vmax.f32 %v15_v45, 1e-06  ;;  %v46_v57 = vmul.f32 %v30_v44, %v30_v44 }
  0x26   :  { %414 = vmatpush.msrb.mxu0 %v153_v6  ;;  %433 = vmatpush.msrb.mxu1 %v170_v7  ;;  %v176_v48 = vld [vmem:[%s1563_s1 + $0x320] sm:$0xff]  ;;  %v193_v49 = vld [vmem:[%s1563_s1 + $0x3a8] sm:$0xff]  ;;  %v143_v52 = vld [vmem:[%s1563_s1 + $0x218] sm:$0xff]  ;;  %v44_v63 = vmul.f32 %v28_v50, %v28_v50 }
  0x27   :  { %454 = vmatpush.msrb.mxu2 %v185_v8  ;;  %473 = vmatpush.msrb.mxu3 %v202_v9  ;;  %v13_v51 = vld [vmem:[%s1562_s0 + $0x8] sm:$0xff]  ;;  %v160_v53 = vld [vmem:[%s1563_s1 + $0x2a0] sm:$0xff]  ;;  %v175_v55 = vld [vmem:[%s1563_s1 + $0x318] sm:$0xff]  ;;  %v47_v2 = vmul.f32 %v31_v54, %v31_v54  ;;  %v62_v6 = vmul.f32 %v46_v57, %v30_v44 }
  0x28   :  { %415 = vmatpush.msrb.mxu0 %v152_v10  ;;  %434 = vmatpush.msrb.mxu1 %v169_v11  ;;  %v192_v56 = vld [vmem:[%s1563_s1 + $0x3a0] sm:$0xff]  ;;  %v142_v58 = vld [vmem:[%s1563_s1 + $0x210] sm:$0xff]  ;;  %v159_v59 = vld [vmem:[%s1563_s1 + $0x298] sm:$0xff]  ;;  %v29_v60 = vmax.f32 %v13_v51, 1e-06 }
  0x29   :  { %455 = vmatpush.msrb.mxu2 %v184_v12  ;;  %474 = vmatpush.msrb.mxu3 %v201_v13  ;;  %v174_v61 = vld [vmem:[%s1563_s1 + $0x310] sm:$0xff]  ;;  %v191_v62 = vld [vmem:[%s1563_s1 + $0x398] sm:$0xff]  ;;  %v141_v0 = vld [vmem:[%s1563_s1 + $0x208] sm:$0xff]  ;;  %v60_v12 = vmul.f32 %v44_v63, %v28_v50 }
  0x2a   :  { %416 = vmatpush.msrb.mxu0 %v151_v14  ;;  %435 = vmatpush.msrb.mxu1 %v168_v15  ;;  %v158_v1 = vld [vmem:[%s1563_s1 + $0x290] sm:$0xff]  ;;  %v173_v4 = vld [vmem:[%s1563_s1 + $0x308] sm:$0xff]  ;;  %v140_v7 = vld [vmem:[%s1563_s1 + $0x200] sm:$0xff]  ;;  %v45_v8 = vmul.f32 %v29_v60, %v29_v60 }
  0x2b   :  { %456 = vmatpush.msrb.mxu2 %v183_v16  ;;  %475 = vmatpush.msrb.mxu3 %v200_v17  ;;  %v18_v3 = vld [vmem:[%s1562_s0 + $0x30] sm:$0xff]  ;;  %v16_v9 = vld [vmem:[%s1562_s0 + $0x20] sm:$0xff]  ;;  %v157_v10 = vld [vmem:[%s1563_s1 + $0x288] sm:$0xff]  ;;  %v63_v16 = vmul.f32 %v47_v2, %v31_v54 }
  0x2c   :  { %417 = vmatpush.msrb.mxu0 %v150_v18  ;;  %436 = vmatpush.msrb.mxu1 %v167_v19  ;;  %v190_v5 = vld [vmem:[%s1563_s1 + $0x390] sm:$0xff]  ;;  %v172_v11 = vld [vmem:[%s1563_s1 + $0x300] sm:$0xff]  ;;  %v34_v13 = vmax.f32 %v18_v3, 1e-06  ;;  %v19_v14 = vld [vmem:[%s1562_s0 + $0x38] sm:$0xff] }
  0x2d   :  { %457 = vmatpush.msrb.mxu2 %v182_v20  ;;  %476 = vmatpush.msrb.mxu3 %v199_v21  ;;  %v189_v15 = vld [vmem:[%s1563_s1 + $0x388] sm:$0xff]  ;;  %v219_v17 = vld [vmem:[%s1563_s1 + $0x478] sm:$0xff]  ;;  %v32_v18 = vmax.f32 %v16_v9, 1e-06  ;;  %v156_v21 = vld [vmem:[%s1563_s1 + $0x280] sm:$0xff] }
  0x2e   :  { %418 = vmatpush.msrb.mxu0 %v149_v22  ;;  %437 = vmatpush.msrb.mxu1 %v166_v23  ;;  %v17_v19 = vld [vmem:[%s1562_s0 + $0x28] sm:$0xff]  ;;  %v251_v20 = vld [vmem:[%s1563_s1 + $0x578] sm:$0xff]  ;;  %v61_v22 = vmul.f32 %v45_v8, %v29_v60  ;;  %v35_v23 = vmax.f32 %v19_v14, 1e-06  ;;  %v266_v36 = vld [vmem:[%s1563_s1 + $0x5f0] sm:$0xff] }
  0x2f   :  { %458 = vmatpush.msrb.mxu2 %v181_v24  ;;  %477 = vmatpush.msrb.mxu3 %v198_v25  ;;  %v188_v24 = vld [vmem:[%s1563_s1 + $0x380] sm:$0xff]  ;;  %v50_v25 = vmul.f32 %v34_v13, %v34_v13 }
  0x30   :  { %419 = vmatpush.msrb.mxu0 %v148_v26  ;;  %438 = vmatpush.msrb.mxu1 %v165_v27  ;;  %v218_v26 = vld [vmem:[%s1563_s1 + $0x470] sm:$0xff]  ;;  %v235_v27 = vld [vmem:[%s1563_s1 + $0x4f8] sm:$0xff] }
  0x31   :  { %459 = vmatpush.msrb.mxu2 %v180_v28  ;;  %478 = vmatpush.msrb.mxu3 %v197_v29  ;;  %v33_v28 = vmax.f32 %v17_v19, 1e-06  ;;  %v250_v29 = vld [vmem:[%s1563_s1 + $0x570] sm:$0xff] }
  0x32   :  { %420 = vmatpush.msrb.mxu0 %v147_v30  ;;  %439 = vmatpush.msrb.mxu1 %v164_v31  ;;  %v267_v30 = vld [vmem:[%s1563_s1 + $0x5f8] sm:$0xff]  ;;  %v48_v31 = vmul.f32 %v32_v18, %v32_v18 }
  0x33   :  { %460 = vmatpush.msrb.mxu2 %v179_v32  ;;  %479 = vmatpush.msrb.mxu3 %v196_v33  ;;  %v217_v32 = vld [vmem:[%s1563_s1 + $0x468] sm:$0xff]  ;;  %v234_v33 = vld [vmem:[%s1563_s1 + $0x4f0] sm:$0xff] }
  0x34   :  { %421 = vmatpush.msrb.mxu0 %v146_v34  ;;  %440 = vmatpush.msrb.mxu1 %v163_v35  ;;  %v51_v34 = vmul.f32 %v35_v23, %v35_v23  ;;  %v249_v35 = vld [vmem:[%s1563_s1 + $0x568] sm:$0xff] }
  0x35   :  { %461 = vmatpush.msrb.mxu2 %v178_v37  ;;  %480 = vmatpush.msrb.mxu3 %v195_v38  ;;  %v66_v37 = vmul.f32 %v50_v25, %v34_v13  ;;  %v216_v38 = vld [vmem:[%s1563_s1 + $0x460] sm:$0xff] }
  0x36   :  { %422 = vmatpush.msrb.mxu0 %v145_v39  ;;  %441 = vmatpush.msrb.mxu1 %v162_v40  ;;  %v49_v39 = vmul.f32 %v33_v28, %v33_v28 }
  0x37   :  { %462 = vmatpush.msrb.mxu2 %v177_v42  ;;  %481 = vmatpush.msrb.mxu3 %v194_v43 }
  0x38   :  { %423 = vmatpush.msrb.mxu0 %v144_v46  ;;  %442 = vmatpush.msrb.mxu1 %v161_v47 }
  0x39   :  { %463 = vmatpush.msrb.mxu2 %v176_v48  ;;  %482 = vmatpush.msrb.mxu3 %v193_v49 }
  0x3a   :  { %424 = vmatpush.msrb.mxu0 %v143_v52  ;;  %443 = vmatpush.msrb.mxu1 %v160_v53 }
  0x3b   :  { %464 = vmatpush.msrb.mxu2 %v175_v55  ;;  %483 = vmatpush.msrb.mxu3 %v192_v56 }
  0x3c   :  { %425 = vmatpush.msrb.mxu0 %v142_v58  ;;  %444 = vmatpush.msrb.mxu1 %v159_v59 }
  0x3d   :  { %465 = vmatpush.msrb.mxu2 %v174_v61  ;;  %484 = vmatpush.msrb.mxu3 %v191_v62 }
  0x3e   :  { %426 = vmatpush.msrb.mxu0 %v141_v0  ;;  %445 = vmatpush.msrb.mxu1 %v158_v1 }
  0x3f   :  { %466 = vmatpush.msrb.mxu2 %v173_v4  ;;  %485 = vmatpush.msrb.mxu3 %v190_v5 }
  0x40   :  { %388 = vmatmul.f32.vlgmr.msra.gmra.mxu2 %v62_v6  ;;  %427 = vmatpush.msrb.mxu0 %v140_v7 }
  0x41   :  { %446 = vmatpush.msrb.mxu1 %v157_v10  ;;  %467 = vmatpush.msrb.mxu2 %v172_v11 }
  0x42   :  { %486 = vmatpush.msrb.mxu3 %v189_v15  ;;  %348 = vmatmul.f32.vlgmr.msra.gmra.mxu0 %v60_v12 }
  0x43   :  { %408 = vmatmul.f32.vlgmr.msra.gmra.mxu3 %v63_v16  ;;  %492 = vmatpush.msra.mxu0 %v219_v17 }
  0x44   :  { %532 = vmatpush.msra.mxu2 %v251_v20  ;;  %447 = vmatpush.msrb.mxu1 %v156_v21 }
  0x45   :  { %487 = vmatpush.msrb.mxu3 %v188_v24  ;;  %368 = vmatmul.f32.vlgmr.msra.gmra.mxu1 %v61_v22 }
  0x46   :  { %493 = vmatpush.msra.mxu0 %v218_v26  ;;  %512 = vmatpush.msra.mxu1 %v235_v27 }
  0x47   :  { %533 = vmatpush.msra.mxu2 %v250_v29  ;;  %552 = vmatpush.msra.mxu3 %v267_v30 }
  0x48   :  { %7 = vsyncpa [#allocation3], 0  ;;  %494 = vmatpush.msra.mxu0 %v217_v32  ;;  %513 = vmatpush.msra.mxu1 %v234_v33  ;;  %v233_v40 = vld [vmem:[%s1563_s1 + $0x4e8] sm:$0xff]  ;;  %v248_v41 = vld [vmem:[%s1563_s1 + $0x560] sm:$0xff]  ;;  %v64_v42 = vmul.f32 %v48_v31, %v32_v18  ;;  %v67_v44 = vmul.f32 %v51_v34, %v35_v23  ;;  %v65_v48 = vmul.f32 %v49_v39, %v33_v28  ;;  %s663_s22 = sshll.u32 %s1564_s2, 4  ;;  %vm654_vm4 = vcmask 64512   ;;  %s664_s22 = int_to_ptr.hbm [resolvable:$true] %s663_s22 }
  0x49   :  { %534 = vmatpush.msra.mxu2 %v249_v35  ;;  %553 = vmatpush.msra.mxu3 %v266_v36  ;;  %v265_v43 = vld [vmem:[%s1563_s1 + $0x5e8] sm:$0xff]  ;;  %v215_v45 = vld [vmem:[%s1563_s1 + $0x458] sm:$0xff]  ;;  %v232_v46 = vld [vmem:[%s1563_s1 + $0x4e0] sm:$0xff] }
  0x4a   :  { %468 = vmatmul.f32.vlgmr.msrb.gmra.mxu2 %v66_v37  ;;  %495 = vmatpush.msra.mxu0 %v216_v38  ;;  %v247_v47 = vld [vmem:[%s1563_s1 + $0x558] sm:$0xff]  ;;  %v264_v49 = vld [vmem:[%s1563_s1 + $0x5e0] sm:$0xff]  ;;  %v214_v50 = vld [vmem:[%s1563_s1 + $0x450] sm:$0xff] }
  0x4b   :  { %514 = vmatpush.msra.mxu1 %v233_v40  ;;  %535 = vmatpush.msra.mxu2 %v248_v41  ;;  %v231_v51 = vld [vmem:[%s1563_s1 + $0x4d8] sm:$0xff]  ;;  %v246_v52 = vld [vmem:[%s1563_s1 + $0x550] sm:$0xff]  ;;  %v213_v54 = vld [vmem:[%s1563_s1 + $0x448] sm:$0xff] }
  0x4c   :  { %554 = vmatpush.msra.mxu3 %v265_v43  ;;  %428 = vmatmul.f32.vlgmr.msrb.gmra.mxu0 %v64_v42  ;;  %v263_v53 = vld [vmem:[%s1563_s1 + $0x5d8] sm:$0xff]  ;;  %v230_v55 = vld [vmem:[%s1563_s1 + $0x4d0] sm:$0xff]  ;;  %v245_v56 = vld [vmem:[%s1563_s1 + $0x548] sm:$0xff] }
  0x4d   :  { %488 = vmatmul.f32.vlgmr.msrb.gmra.mxu3 %v67_v44  ;;  %496 = vmatpush.msra.mxu0 %v215_v45  ;;  %v262_v57 = vld [vmem:[%s1563_s1 + $0x5d0] sm:$0xff]  ;;  %v212_v58 = vld [vmem:[%s1563_s1 + $0x440] sm:$0xff]  ;;  %v229_v59 = vld [vmem:[%s1563_s1 + $0x4c8] sm:$0xff] }
  0x4e   :  { %515 = vmatpush.msra.mxu1 %v232_v46  ;;  %536 = vmatpush.msra.mxu2 %v247_v47  ;;  %v244_v60 = vld [vmem:[%s1563_s1 + $0x540] sm:$0xff]  ;;  %v261_v61 = vld [vmem:[%s1563_s1 + $0x5c8] sm:$0xff]  ;;  %v211_v62 = vld [vmem:[%s1563_s1 + $0x438] sm:$0xff] }
  0x4f   :  { %555 = vmatpush.msra.mxu3 %v264_v49  ;;  %448 = vmatmul.f32.vlgmr.msrb.gmra.mxu1 %v65_v48  ;;  %v228_v63 = vld [vmem:[%s1563_s1 + $0x4c0] sm:$0xff]  ;;  %v243_v0 = vld [vmem:[%s1563_s1 + $0x538] sm:$0xff]  ;;  %v210_v2 = vld [vmem:[%s1563_s1 + $0x430] sm:$0xff] }
  0x50   :  { %497 = vmatpush.msra.mxu0 %v214_v50  ;;  %516 = vmatpush.msra.mxu1 %v231_v51  ;;  %v260_v1 = vld [vmem:[%s1563_s1 + $0x5c0] sm:$0xff]  ;;  %v227_v3 = vld [vmem:[%s1563_s1 + $0x4b8] sm:$0xff]  ;;  %v242_v4 = vld [vmem:[%s1563_s1 + $0x530] sm:$0xff] }
  0x51   :  { %537 = vmatpush.msra.mxu2 %v246_v52  ;;  %556 = vmatpush.msra.mxu3 %v263_v53  ;;  %v259_v5 = vld [vmem:[%s1563_s1 + $0x5b8] sm:$0xff]  ;;  %v209_v6 = vld [vmem:[%s1563_s1 + $0x428] sm:$0xff]  ;;  %v226_v7 = vld [vmem:[%s1563_s1 + $0x4b0] sm:$0xff] }
  0x52   :  { %498 = vmatpush.msra.mxu0 %v213_v54  ;;  %517 = vmatpush.msra.mxu1 %v230_v55  ;;  %v20_v8 = vld [vmem:[%s1562_s0 + $0x40] sm:$0xff]  ;;  %v22_v9 = vld [vmem:[%s1562_s0 + $0x50] sm:$0xff]  ;;  %v241_v10 = vld [vmem:[%s1563_s1 + $0x528] sm:$0xff] }
  0x53   :  { %538 = vmatpush.msra.mxu2 %v245_v56  ;;  %557 = vmatpush.msra.mxu3 %v262_v57  ;;  %v258_v11 = vld [vmem:[%s1563_s1 + $0x5b0] sm:$0xff]  ;;  %v208_v12 = vld [vmem:[%s1563_s1 + $0x420] sm:$0xff]  ;;  %v225_v13 = vld [vmem:[%s1563_s1 + $0x4a8] sm:$0xff]  ;;  %v36_v16 = vmax.f32 %v20_v8, 1e-06 }
  0x54   :  { %499 = vmatpush.msra.mxu0 %v212_v58  ;;  %518 = vmatpush.msra.mxu1 %v229_v59  ;;  %v240_v14 = vld [vmem:[%s1563_s1 + $0x520] sm:$0xff]  ;;  %v257_v15 = vld [vmem:[%s1563_s1 + $0x5a8] sm:$0xff]  ;;  %v38_v17 = vmax.f32 %v22_v9, 1e-06  ;;  %v23_v19 = vld [vmem:[%s1562_s0 + $0x58] sm:$0xff] }
  0x55   :  { %539 = vmatpush.msra.mxu2 %v244_v60  ;;  %558 = vmatpush.msra.mxu3 %v261_v61  ;;  %v21_v18 = vld [vmem:[%s1562_s0 + $0x48] sm:$0xff]  ;;  %v207_v20 = vld [vmem:[%s1563_s1 + $0x418] sm:$0xff]  ;;  %v224_v21 = vld [vmem:[%s1563_s1 + $0x4a0] sm:$0xff]  ;;  %v39_v27 = vmax.f32 %v23_v19, 1e-06  ;;  %v52_v30 = vmul.f32 %v36_v16, %v36_v16 }
  0x56   :  { %500 = vmatpush.msra.mxu0 %v211_v62  ;;  %519 = vmatpush.msra.mxu1 %v228_v63  ;;  %v239_v22 = vld [vmem:[%s1563_s1 + $0x518] sm:$0xff]  ;;  %v256_v23 = vld [vmem:[%s1563_s1 + $0x5a0] sm:$0xff]  ;;  %v206_v24 = vld [vmem:[%s1563_s1 + $0x410] sm:$0xff]  ;;  %v37_v26 = vmax.f32 %v21_v18, 1e-06  ;;  %v54_v31 = vmul.f32 %v38_v17, %v38_v17 }
  0x57   :  { %540 = vmatpush.msra.mxu2 %v243_v0  ;;  %559 = vmatpush.msra.mxu3 %v260_v1  ;;  %v223_v25 = vld [vmem:[%s1563_s1 + $0x498] sm:$0xff]  ;;  %v238_v28 = vld [vmem:[%s1563_s1 + $0x510] sm:$0xff]  ;;  %v205_v32 = vld [vmem:[%s1563_s1 + $0x408] sm:$0xff]  ;;  %v55_v39 = vmul.f32 %v39_v27, %v39_v27  ;;  %v68_v42 = vmul.f32 %v52_v30, %v36_v16 }
  0x58   :  { %501 = vmatpush.msra.mxu0 %v210_v2  ;;  %520 = vmatpush.msra.mxu1 %v227_v3  ;;  %v255_v29 = vld [vmem:[%s1563_s1 + $0x598] sm:$0xff]  ;;  %v222_v33 = vld [vmem:[%s1563_s1 + $0x490] sm:$0xff]  ;;  %v237_v34 = vld [vmem:[%s1563_s1 + $0x508] sm:$0xff]  ;;  %v53_v38 = vmul.f32 %v37_v26, %v37_v26  ;;  %v70_v43 = vmul.f32 %v54_v31, %v38_v17 }
  0x59   :  { %541 = vmatpush.msra.mxu2 %v242_v4  ;;  %560 = vmatpush.msra.mxu3 %v259_v5  ;;  %v254_v35 = vld [vmem:[%s1563_s1 + $0x590] sm:$0xff]  ;;  %v204_v36 = vld [vmem:[%s1563_s1 + $0x400] sm:$0xff]  ;;  %v221_v37 = vld [vmem:[%s1563_s1 + $0x488] sm:$0xff]  ;;  %v71_v49 = vmul.f32 %v55_v39, %v39_v27 }
  0x5a   :  { %502 = vmatpush.msra.mxu0 %v209_v6  ;;  %521 = vmatpush.msra.mxu1 %v226_v7  ;;  %v236_v40 = vld [vmem:[%s1563_s1 + $0x500] sm:$0xff]  ;;  %v253_v41 = vld [vmem:[%s1563_s1 + $0x588] sm:$0xff]  ;;  %v283_v44 = vld [vmem:[%s1563_s1 + $0x678] sm:$0xff]  ;;  %v69_v48 = vmul.f32 %v53_v38, %v37_v26 }
  0x5b   :  { %542 = vmatpush.msra.mxu2 %v241_v10  ;;  %561 = vmatpush.msra.mxu3 %v258_v11  ;;  %v315_v45 = vld [vmem:[%s1563_s1 + $0x778] sm:$0xff]  ;;  %v220_v46 = vld [vmem:[%s1563_s1 + $0x480] sm:$0xff]  ;;  %v282_v50 = vld [vmem:[%s1563_s1 + $0x670] sm:$0xff] }
  0x5c   :  { %503 = vmatpush.msra.mxu0 %v208_v12  ;;  %522 = vmatpush.msra.mxu1 %v225_v13  ;;  %v252_v47 = vld [vmem:[%s1563_s1 + $0x580] sm:$0xff]  ;;  %v299_v51 = vld [vmem:[%s1563_s1 + $0x6f8] sm:$0xff]  ;;  %v314_v52 = vld [vmem:[%s1563_s1 + $0x770] sm:$0xff] }
  0x5d   :  { %543 = vmatpush.msra.mxu2 %v240_v14  ;;  %562 = vmatpush.msra.mxu3 %v257_v15  ;;  %v331_v53 = vld [vmem:[%s1563_s1 + $0x7f8] sm:$0xff]  ;;  %v281_v54 = vld [vmem:[%s1563_s1 + $0x668] sm:$0xff]  ;;  %v298_v55 = vld [vmem:[%s1563_s1 + $0x6f0] sm:$0xff] }
  0x5e   :  { %504 = vmatpush.msra.mxu0 %v207_v20  ;;  %523 = vmatpush.msra.mxu1 %v224_v21  ;;  %v313_v56 = vld [vmem:[%s1563_s1 + $0x768] sm:$0xff]  ;;  %v330_v57 = vld [vmem:[%s1563_s1 + $0x7f0] sm:$0xff]  ;;  %v280_v58 = vld [vmem:[%s1563_s1 + $0x660] sm:$0xff] }
  0x5f   :  { %544 = vmatpush.msra.mxu2 %v239_v22  ;;  %563 = vmatpush.msra.mxu3 %v256_v23  ;;  %v297_v59 = vld [vmem:[%s1563_s1 + $0x6e8] sm:$0xff]  ;;  %v312_v60 = vld [vmem:[%s1563_s1 + $0x760] sm:$0xff]  ;;  %v279_v62 = vld [vmem:[%s1563_s1 + $0x658] sm:$0xff] }
  0x60   :  { %505 = vmatpush.msra.mxu0 %v206_v24  ;;  %524 = vmatpush.msra.mxu1 %v223_v25  ;;  %v329_v61 = vld [vmem:[%s1563_s1 + $0x7e8] sm:$0xff]  ;;  %v296_v63 = vld [vmem:[%s1563_s1 + $0x6e0] sm:$0xff]  ;;  %v311_v0 = vld [vmem:[%s1563_s1 + $0x758] sm:$0xff] }
  0x61   :  { %545 = vmatpush.msra.mxu2 %v238_v28  ;;  %564 = vmatpush.msra.mxu3 %v255_v29  ;;  %v328_v1 = vld [vmem:[%s1563_s1 + $0x7e0] sm:$0xff]  ;;  %v278_v2 = vld [vmem:[%s1563_s1 + $0x650] sm:$0xff]  ;;  %v295_v3 = vld [vmem:[%s1563_s1 + $0x6d8] sm:$0xff] }
  0x62   :  { %506 = vmatpush.msra.mxu0 %v205_v32  ;;  %525 = vmatpush.msra.mxu1 %v222_v33  ;;  %v310_v4 = vld [vmem:[%s1563_s1 + $0x750] sm:$0xff]  ;;  %v327_v5 = vld [vmem:[%s1563_s1 + $0x7d8] sm:$0xff]  ;;  %v277_v6 = vld [vmem:[%s1563_s1 + $0x648] sm:$0xff] }
  0x63   :  { %546 = vmatpush.msra.mxu2 %v237_v34  ;;  %565 = vmatpush.msra.mxu3 %v254_v35  ;;  %v294_v7 = vld [vmem:[%s1563_s1 + $0x6d0] sm:$0xff]  ;;  %v309_v8 = vld [vmem:[%s1563_s1 + $0x748] sm:$0xff]  ;;  %v276_v10 = vld [vmem:[%s1563_s1 + $0x640] sm:$0xff] }
  0x64   :  { %507 = vmatpush.msra.mxu0 %v204_v36  ;;  %526 = vmatpush.msra.mxu1 %v221_v37  ;;  %v326_v9 = vld [vmem:[%s1563_s1 + $0x7d0] sm:$0xff]  ;;  %v293_v11 = vld [vmem:[%s1563_s1 + $0x6c8] sm:$0xff]  ;;  %v308_v12 = vld [vmem:[%s1563_s1 + $0x740] sm:$0xff] }
  0x65   :  { %547 = vmatpush.msra.mxu2 %v236_v40  ;;  %566 = vmatpush.msra.mxu3 %v253_v41  ;;  %v325_v13 = vld [vmem:[%s1563_s1 + $0x7c8] sm:$0xff]  ;;  %v275_v14 = vld [vmem:[%s1563_s1 + $0x638] sm:$0xff]  ;;  %v292_v15 = vld [vmem:[%s1563_s1 + $0x6c0] sm:$0xff] }
  0x66   :  { %508 = vmatmul.f32.vlgmr.msra.gmra.mxu0 %v68_v42  ;;  %548 = vmatmul.f32.vlgmr.msra.gmra.mxu2 %v70_v43  ;;  %v307_v16 = vld [vmem:[%s1563_s1 + $0x738] sm:$0xff]  ;;  %v324_v17 = vld [vmem:[%s1563_s1 + $0x7c0] sm:$0xff]  ;;  %v274_v18 = vld [vmem:[%s1563_s1 + $0x630] sm:$0xff] }
  0x67   :  { %572 = vmatpush.msrb.mxu0 %v283_v44  ;;  %612 = vmatpush.msrb.mxu2 %v315_v45  ;;  %v291_v19 = vld [vmem:[%s1563_s1 + $0x6b8] sm:$0xff]  ;;  %v306_v20 = vld [vmem:[%s1563_s1 + $0x730] sm:$0xff]  ;;  %v273_v22 = vld [vmem:[%s1563_s1 + $0x628] sm:$0xff] }
  0x68   :  { %527 = vmatpush.msra.mxu1 %v220_v46  ;;  %567 = vmatpush.msra.mxu3 %v252_v47  ;;  %v323_v21 = vld [vmem:[%s1563_s1 + $0x7b8] sm:$0xff]  ;;  %v290_v23 = vld [vmem:[%s1563_s1 + $0x6b0] sm:$0xff]  ;;  %v24_v24 = vld [vmem:[%s1562_s0 + $0x60] sm:$0xff] }
  0x69   :  { %528 = vmatmul.f32.vlgmr.msra.gmra.mxu1 %v69_v48  ;;  %568 = vmatmul.f32.vlgmr.msra.gmra.mxu3 %v71_v49  ;;  %v26_v25 = vld [vmem:[%s1562_s0 + $0x70] sm:$0xff]  ;;  %v305_v26 = vld [vmem:[%s1563_s1 + $0x728] sm:$0xff]  ;;  %v272_v28 = vld [vmem:[%s1563_s1 + $0x620] sm:$0xff]  ;;  %v40_v34 = vmax.f32 %v24_v24, 1e-06 }
  0x6a   :  { %573 = vmatpush.msrb.mxu0 %v282_v50  ;;  %592 = vmatpush.msrb.mxu1 %v299_v51  ;;  %v322_v27 = vld [vmem:[%s1563_s1 + $0x7b0] sm:$0xff]  ;;  %v289_v29 = vld [vmem:[%s1563_s1 + $0x6a8] sm:$0xff]  ;;  %v27_v31 = vld [vmem:[%s1562_s0 + $0x78] sm:$0xff]  ;;  %v42_v35 = vmax.f32 %v26_v25, 1e-06 }
  0x6b   :  { %613 = vmatpush.msrb.mxu2 %v314_v52  ;;  %632 = vmatpush.msrb.mxu3 %v331_v53  ;;  %v25_v30 = vld [vmem:[%s1562_s0 + $0x68] sm:$0xff]  ;;  %v304_v32 = vld [vmem:[%s1563_s1 + $0x720] sm:$0xff]  ;;  %v271_v36 = vld [vmem:[%s1563_s1 + $0x618] sm:$0xff]  ;;  %v43_v41 = vmax.f32 %v27_v31, 1e-06  ;;  %v56_v46 = vmul.f32 %v40_v34, %v40_v34 }
  0x6c   :  { %574 = vmatpush.msrb.mxu0 %v281_v54  ;;  %593 = vmatpush.msrb.mxu1 %v298_v55  ;;  %v321_v33 = vld [vmem:[%s1563_s1 + $0x7a8] sm:$0xff]  ;;  %v288_v37 = vld [vmem:[%s1563_s1 + $0x6a0] sm:$0xff]  ;;  %v303_v38 = vld [vmem:[%s1563_s1 + $0x718] sm:$0xff]  ;;  %v41_v40 = vmax.f32 %v25_v30, 1e-06  ;;  %v58_v47 = vmul.f32 %v42_v35, %v42_v35 }
  0x6d   :  { %614 = vmatpush.msrb.mxu2 %v313_v56  ;;  %633 = vmatpush.msrb.mxu3 %v330_v57  ;;  %v320_v39 = vld [vmem:[%s1563_s1 + $0x7a0] sm:$0xff]  ;;  %v270_v42 = vld [vmem:[%s1563_s1 + $0x610] sm:$0xff]  ;;  %v287_v43 = vld [vmem:[%s1563_s1 + $0x698] sm:$0xff]  ;;  %v59_v53 = vmul.f32 %v43_v41, %v43_v41 }
  0x6e   :  { %575 = vmatpush.msrb.mxu0 %v280_v58  ;;  %594 = vmatpush.msrb.mxu1 %v297_v59  ;;  %v302_v44 = vld [vmem:[%s1563_s1 + $0x710] sm:$0xff]  ;;  %v319_v45 = vld [vmem:[%s1563_s1 + $0x798] sm:$0xff]  ;;  %v269_v48 = vld [vmem:[%s1563_s1 + $0x608] sm:$0xff]  ;;  %v57_v52 = vmul.f32 %v41_v40, %v41_v40  ;;  %v72_v58 = vmul.f32 %v56_v46, %v40_v34  ;;  %v74_v59 = vmul.f32 %v58_v47, %v42_v35 }
  0x6f   :  { %615 = vmatpush.msrb.mxu2 %v312_v60  ;;  %634 = vmatpush.msrb.mxu3 %v329_v61  ;;  %v286_v49 = vld [vmem:[%s1563_s1 + $0x690] sm:$0xff]  ;;  %v301_v50 = vld [vmem:[%s1563_s1 + $0x708] sm:$0xff]  ;;  %v268_v54 = vld [vmem:[%s1563_s1 + $0x600] sm:$0xff] }
  0x70   :  { %576 = vmatpush.msrb.mxu0 %v279_v62  ;;  %595 = vmatpush.msrb.mxu1 %v296_v63  ;;  %v318_v51 = vld [vmem:[%s1563_s1 + $0x790] sm:$0xff]  ;;  %v285_v55 = vld [vmem:[%s1563_s1 + $0x688] sm:$0xff]  ;;  %v300_v56 = vld [vmem:[%s1563_s1 + $0x700] sm:$0xff]  ;;  %v73_v62 = vmul.f32 %v57_v52, %v41_v40  ;;  %v75_v63 = vmul.f32 %v59_v53, %v43_v41 }
  0x71   :  { %616 = vmatpush.msrb.mxu2 %v311_v0  ;;  %635 = vmatpush.msrb.mxu3 %v328_v1  ;;  %v317_v57 = vld [vmem:[%s1563_s1 + $0x788] sm:$0xff]  ;;  %v284_v60 = vld [vmem:[%s1563_s1 + $0x680] sm:$0xff] }
  0x72   :  { %577 = vmatpush.msrb.mxu0 %v278_v2  ;;  %596 = vmatpush.msrb.mxu1 %v295_v3  ;;  %v316_v61 = vld [vmem:[%s1563_s1 + $0x780] sm:$0xff]  ;;  %s727_s1 = smov [#allocation2]  }
  0x73   :  { %617 = vmatpush.msrb.mxu2 %v310_v4  ;;  %636 = vmatpush.msrb.mxu3 %v327_v5  ;;  %s661_s19 = sshll.u32 %s727_s1, 4  ;;  %s662_s19 = int_to_ptr.vmem [resolvable:$true] %s661_s19 }
  0x74   :  { %578 = vmatpush.msrb.mxu0 %v277_v6  ;;  %597 = vmatpush.msrb.mxu1 %v294_v7 }
  0x75   :  { %618 = vmatpush.msrb.mxu2 %v309_v8  ;;  %637 = vmatpush.msrb.mxu3 %v326_v9 }
  0x76   :  { %579 = vmatpush.msrb.mxu0 %v276_v10  ;;  %598 = vmatpush.msrb.mxu1 %v293_v11 }
  0x77   :  { %619 = vmatpush.msrb.mxu2 %v308_v12  ;;  %638 = vmatpush.msrb.mxu3 %v325_v13 }
  0x78   :  { %580 = vmatpush.msrb.mxu0 %v275_v14  ;;  %599 = vmatpush.msrb.mxu1 %v292_v15 }
  0x79   :  { %620 = vmatpush.msrb.mxu2 %v307_v16  ;;  %639 = vmatpush.msrb.mxu3 %v324_v17 }
  0x7a   :  { %581 = vmatpush.msrb.mxu0 %v274_v18  ;;  %600 = vmatpush.msrb.mxu1 %v291_v19 }
  0x7b   :  { %621 = vmatpush.msrb.mxu2 %v306_v20  ;;  %640 = vmatpush.msrb.mxu3 %v323_v21 }
  0x7c   :  { %582 = vmatpush.msrb.mxu0 %v273_v22  ;;  %601 = vmatpush.msrb.mxu1 %v290_v23 }
  0x7d   :  { %622 = vmatpush.msrb.mxu2 %v305_v26  ;;  %641 = vmatpush.msrb.mxu3 %v322_v27 }
  0x7e   :  { %583 = vmatpush.msrb.mxu0 %v272_v28  ;;  %602 = vmatpush.msrb.mxu1 %v289_v29 }
  0x7f   :  { %623 = vmatpush.msrb.mxu2 %v304_v32  ;;  %642 = vmatpush.msrb.mxu3 %v321_v33 }
  0x80   :  { %584 = vmatpush.msrb.mxu0 %v271_v36  ;;  %603 = vmatpush.msrb.mxu1 %v288_v37 }
  0x81   :  { %624 = vmatpush.msrb.mxu2 %v303_v38  ;;  %643 = vmatpush.msrb.mxu3 %v320_v39 }
  0x82   :  { %585 = vmatpush.msrb.mxu0 %v270_v42  ;;  %604 = vmatpush.msrb.mxu1 %v287_v43 }
  0x83   :  { %625 = vmatpush.msrb.mxu2 %v302_v44  ;;  %644 = vmatpush.msrb.mxu3 %v319_v45 }
  0x84   :  { %586 = vmatpush.msrb.mxu0 %v269_v48  ;;  %605 = vmatpush.msrb.mxu1 %v286_v49 }
  0x85   :  { %626 = vmatpush.msrb.mxu2 %v301_v50  ;;  %645 = vmatpush.msrb.mxu3 %v318_v51 }
  0x86   :  { %587 = vmatpush.msrb.mxu0 %v268_v54  ;;  %606 = vmatpush.msrb.mxu1 %v285_v55 }
  0x87   :  { %627 = vmatpush.msrb.mxu2 %v300_v56  ;;  %646 = vmatpush.msrb.mxu3 %v317_v57 }
  0x88   :  { %588 = vmatmul.f32.vlgmr.msrb.gmra.mxu0 %v72_v58  ;;  %628 = vmatmul.f32.vlgmr.msrb.gmra.mxu2 %v74_v59 }
  0x89   :  { %607 = vmatpush.msrb.mxu1 %v284_v60  ;;  %647 = vmatpush.msrb.mxu3 %v316_v61 }
  0x8a   :  { %608 = vmatmul.f32.vlgmr.msrb.gmra.mxu1 %v73_v62  ;;  %648 = vmatmul.f32.vlgmr.msrb.gmra.mxu3 %v75_v63 }
  0xbf   :  { %v349_v1 = vpop.f32.mrf.mxu0 }
  0xc2   :  { %v369_v0 = vpop.f32.mrf.mxu1 }
  0xc3   :  { %v370_v2 = vadd.f32 %v369_v0, %v349_v1  ;;  %v389_v3 = vpop.f32.mrf.mxu2 }
  0xc5   :  { %v390_v4 = vadd.f32 %v389_v3, %v370_v2 }
  0xc6   :  { %v409_v5 = vpop.f32.mrf.mxu3 }
  0xc7   :  { %v410_v6 = vadd.f32 %v409_v5, %v390_v4 }
  0xc9   :  { %v429_v7 = vpop.f32.mrf.mxu0 }
  0xca   :  { %v430_v8 = vadd.f32 %v429_v7, %v410_v6 }
  0xcc   :  { %v449_v9 = vpop.f32.mrf.mxu1 }
  0xcd   :  { %v450_v10 = vadd.f32 %v449_v9, %v430_v8  ;;  %v469_v11 = vpop.f32.mrf.mxu2 }
  0xcf   :  { %v470_v12 = vadd.f32 %v469_v11, %v450_v10 }
  0xd0   :  { %v489_v13 = vpop.f32.mrf.mxu3 }
  0xd1   :  { %v490_v15 = vadd.f32 %v489_v13, %v470_v12 }
  0xe3   :  { %v509_v14 = vpop.f32.mrf.mxu0 }
  0xe4   :  { %v510_v16 = vadd.f32 %v509_v14, %v490_v15 }
  0xe6   :  { %v529_v17 = vpop.f32.mrf.mxu1 }
  0xe7   :  { %v530_v19 = vadd.f32 %v529_v17, %v510_v16 }
  0xe9   :  { %v549_v18 = vpop.f32.mrf.mxu2 }
  0xea   :  { %v550_v20 = vadd.f32 %v549_v18, %v530_v19 }
  0xec   :  { %v569_v21 = vpop.f32.mrf.mxu3 }
  0xed   :  { %v570_v22 = vadd.f32 %v569_v21, %v550_v20 }
 0x105   :  { %v589_v23 = vpop.f32.mrf.mxu0 }
 0x106   :  { %v590_v24 = vadd.f32 %v589_v23, %v570_v22 }
 0x107   :  { %v609_v25 = vpop.f32.mrf.mxu1 }
 0x108   :  { %v610_v26 = vadd.f32 %v609_v25, %v590_v24 }
 0x10b   :  { %v629_v27 = vpop.f32.mrf.mxu2 }
 0x10c   :  { %v630_v28 = vadd.f32 %v629_v27, %v610_v26 }
 0x10d   :  { %v649_v29 = vpop.f32.mrf.mxu3 }
 0x10e   :  { %v650_v30 = vadd.f32 %v649_v29, %v630_v28 }
 0x110   :  { %v652_v31 = vmul.f32 0.00390625, %v650_v30 }
 0x112   :  { %v674_v32 = vand.u32 2147483647, %v652_v31  ;;  %v691_v44 = vand.u32 2147483648, %v652_v31  ;;  %vm673_vm2 = vcmp.lt.f32.partialorder %v652_v31, 0.0  ;;  %vm672_vm3 = vcmp.eq.f32.partialorder %v652_v31, 0.0 }
 0x114   :  { %697 = vlog2.f32 %v674_v32  ;;  %vm688_vm0 = vweird.f32 %v674_v32  ;;  %vm690_vm1 = vcmp.eq.f32.partialorder %v674_v32, 0.0  ;;  %vm675_vm5 = vcmp.eq.f32.partialorder %v674_v32, inf }
 0x11a   :  { %v698_v33 = vpop.eup %697 }
 0x11b   :  { %v678_v34 = vmul.f32 -0.33333334, %v698_v33 }
 0x11d   :  { %699 = vpow2.f32 %v678_v34 }
 0x123   :  { %v700_v35 = vpop.eup %699 }
 0x124   :  { %v680_v36 = vmul.f32 %v700_v35, %v700_v35 }
 0x126   :  { %v681_v37 = vmul.f32 %v680_v36, %v674_v32 }
 0x128   :  { %v682_v38 = vmul.f32 %v681_v37, %v680_v36 }
 0x12a   :  { %v683_v39 = vsub.f32 %v682_v38, %v700_v35 }
 0x12c   :  { %v684_v40 = vmul.f32 -0.33333334, %v683_v39 }
 0x12e   :  { %v685_v41 = vadd.f32 %v700_v35, %v684_v40 }
 0x130   :  { %v686_v42 = vmul.f32 %v685_v41, %v652_v31 }
 0x132   :  { %v687_v43 = vmul.f32 %v686_v42, %v685_v41 }
 0x134   :  { %v689_v45 = vsel %vm688_vm0, %v652_v31, %v687_v43 }
 0x135   :  { %v692_v46 = vsel %vm690_vm1, %v691_v44, %v689_v45 }
 0x136   :  { %v693_v47 = vsel %vm673_vm2, nan, %v692_v46 }
 0x137   :  { %v694_v48 = vsel %vm672_vm3, 0.0, %v693_v47 }
 0x138   :  { %v695_v49 = vsel %vm675_vm5, inf, %v694_v48 }
 0x139   :  { %655 = vst.msk [vmem:[#allocation2] sm:$0xff] %vm654_vm4, %v695_v49 }
 0x13a   :  { %666 = dma.vmem_to_hbm [thread:$0]  %s662_s19, 128, %s664_s22, [#allocation3]  }
 0x13b   :  { %725 = dma.done.wait [#allocation3], 128  }
 0x13c   :  { %726 = vsyncadd [#allocation3], 4294967168 }
 0x13d   :  { %671 = vsyncpa [#allocation3], 1 }

</bundles_post_ra>
